<compile_context>
chip_gen: v7x
topology: tpu7x:2x2x1
jax: 0.10.0
libtpu: 0.0.40
codegen_flags: <defaults>
</compile_context>

<pallas_src>
import jax
import jax.numpy as jnp
from jax.experimental import pallas as pl
from jax.experimental.pallas import tpu as pltpu

BN_EPS = 1e-5
LANE = 128


def _round_up(x, m):
    return (x + m - 1) // m * m


def _ae_kernel(x_ref, w1_ref, w2_ref, w3_ref, w4_ref, vec_ref,
               latent_ref, recon_ref):
    """Whole autoencoder forward in one kernel (all tensors resident in VMEM).

    vec_ref rows: [g1, be1, g2, be2, g3, be3, b4, 0] (each zero-padded to width W).
    """
    inv_b = jnp.float32(1.0 / x_ref.shape[0])

    h1_p = w1_ref.shape[1]
    h2_p = w2_ref.shape[1]
    n_p = w4_ref.shape[1]

    def linear_bn_relu(h_bf16, w_ref, g, be):
        # Linear on the MXU in bf16, f32 accumulation.
        # (Linear bias omitted: BN's mean subtraction cancels it exactly.)
        y = jnp.dot(h_bf16, w_ref[...], preferred_element_type=jnp.float32)

        # BatchNorm1d, training mode: biased batch statistics over axis 0.
        mu = jnp.sum(y, axis=0, keepdims=True) * inv_b             # (1, N)
        ex2 = jnp.sum(y * y, axis=0, keepdims=True) * inv_b        # (1, N)
        var = jnp.maximum(ex2 - mu * mu, 0.0)                      # (1, N)

        # Fused BN affine on tiny (1, N) vectors; rsqrt -> EUP.
        scale = g * jax.lax.rsqrt(var + BN_EPS)                    # (1, N)
        shift = be - mu * scale                                    # (1, N)

        # Normalize + affine + ReLU: two full-tile VPU ops + max.
        return jnp.maximum(y * scale + shift, 0.0)

    x = x_ref[...]  # already bf16, lane-padded

    # Encoder
    h1 = linear_bn_relu(x, w1_ref,
                        vec_ref[0:1, :h1_p], vec_ref[1:2, :h1_p])
    latent = linear_bn_relu(h1.astype(jnp.bfloat16), w2_ref,
                            vec_ref[2:3, :h2_p], vec_ref[3:4, :h2_p])
    latent_ref[...] = latent

    # Decoder
    d1 = linear_bn_relu(latent.astype(jnp.bfloat16), w3_ref,
                        vec_ref[4:5, :h1_p], vec_ref[5:6, :h1_p])
    recon = jnp.dot(d1.astype(jnp.bfloat16), w4_ref[...],
                    preferred_element_type=jnp.float32) + vec_ref[6:7, :n_p]
    recon_ref[...] = recon


def autoencoder_forward(x, params):
    """x: (batch, seq_len, num_features) float32. Returns (latent, x_reconstruct)."""
    batch = x.shape[0]
    x2 = x.reshape(batch, -1).astype(jnp.float32)
    n = x2.shape[1]
    h1 = params["w1"].shape[1]
    h2 = params["w2"].shape[1]

    # Pad every feature axis up to a full 128-lane multiple so all matmuls and
    # output stores are lane-dense.  Padded columns stay exactly zero.
    n_p = _round_up(n, LANE)
    h1_p = _round_up(h1, LANE)
    h2_p = _round_up(h2, LANE)
    w_max = max(n_p, h1_p, h2_p)

    def pad2(a, rows, cols, dtype):
        r, c = a.shape
        return jnp.pad(a, ((0, rows - r), (0, cols - c))).astype(dtype)

    x_p = pad2(x2, batch, n_p, jnp.bfloat16)

    w1 = pad2(params["w1"], n_p, h1_p, jnp.bfloat16)
    w2 = pad2(params["w2"], h1_p, h2_p, jnp.bfloat16)
    w3 = pad2(params["w3"], h2_p, h1_p, jnp.bfloat16)
    w4 = pad2(params["w4"], h1_p, n_p, jnp.bfloat16)

    # Pack the seven tiny per-feature vectors into one (8, W) slab -> single DMA.
    # Rows: g1, be1, g2, be2, g3, be3, b4, zeros.  Padded lanes are zero, which keeps
    # the padded feature columns exactly zero through BN/ReLU and the final bias add.
    # b1/b2/b3 are intentionally not passed: BN's mean subtraction cancels them.
    def row(v):
        return pad2(v.reshape(1, -1), 1, w_max, jnp.float32)

    vecs = jnp.concatenate(
        [row(params["g1"]), row(params["be1"]),
         row(params["g2"]), row(params["be2"]),
         row(params["g3"]), row(params["be3"]),
         row(params["b4"]),
         jnp.zeros((1, w_max), jnp.float32)],
        axis=0)  # (8, W)

    inputs = (x_p, w1, w2, w3, w4, vecs)

    vmem_spec = pl.BlockSpec(memory_space=pltpu.MemorySpace.VMEM)

    flops = 2 * batch * (n_p * h1_p + h1_p * h2_p + h2_p * h1_p + h1_p * n_p)
    transcendentals = h1_p + h2_p + h1_p  # one rsqrt per BN feature
    bytes_accessed = (
        x_p.size * 2
        + (w1.size + w2.size + w3.size + w4.size) * 2
        + vecs.size * 4
        + batch * (h2_p + n_p) * 4
    )

    latent_p, recon_p = pl.pallas_call(
        _ae_kernel,
        out_shape=(
            jax.ShapeDtypeStruct((batch, h2_p), jnp.float32),
            jax.ShapeDtypeStruct((batch, n_p), jnp.float32),
        ),
        in_specs=[vmem_spec] * len(inputs),
        out_specs=(vmem_spec, vmem_spec),
        cost_estimate=pl.CostEstimate(
            flops=int(flops),
            transcendentals=int(transcendentals),
            bytes_accessed=int(bytes_accessed),
        ),
    )(*inputs)

    # Strip the lane padding outside the kernel.
    return latent_p[:, :h2], recon_p[:, :n]


def init_params(key, n, h1, h2):
    """Deterministic init. Linear weights stored as (in, out), PyTorch-style uniform
    bounds.  BatchNorm: gamma=1, beta=0 (as in nn.BatchNorm1d.__init__)."""
    ks = jax.random.split(key, 8)

    def linear(kw, kb, fan_in, fan_out):
        bound = 1.0 / jnp.sqrt(float(fan_in))
        w = jax.random.uniform(kw, (fan_in, fan_out), jnp.float32, -bound, bound)
        b = jax.random.uniform(kb, (1, fan_out), jnp.float32, -bound, bound)
        return w, b

    w1, b1 = linear(ks[0], ks[1], n, h1)
    w2, b2 = linear(ks[2], ks[3], h1, h2)
    w3, b3 = linear(ks[4], ks[5], h2, h1)
    w4, b4 = linear(ks[6], ks[7], h1, n)

    ones = lambda d: jnp.ones((1, d), jnp.float32)
    zeros = lambda d: jnp.zeros((1, d), jnp.float32)

    return dict(
        w1=w1, b1=b1, g1=ones(h1), be1=zeros(h1),
        w2=w2, b2=b2, g2=ones(h2), be2=zeros(h2),
        w3=w3, b3=b3, g3=ones(h1), be3=zeros(h1),
        w4=w4, b4=b4,
    )


if __name__ == "__main__":
    # Module hyperparameters (consistent with the PyTorch forward):
    num_features = 4
    seq_len = 16
    ratio = 1.0
    n = int(seq_len * ratio) * num_features   # 64
    hidden1 = int(n / 2)                      # 32
    hidden2 = int(n / 8)                      # 8
    batch = 128  # fills the MXU M dim / 8-sublane tile; >1 required for train-mode BN

    key = jax.random.PRNGKey(0)
    kx, kp = jax.random.split(key)
    x = jax.random.normal(kx, (batch, seq_len, num_features), jnp.float32)
    params = init_params(kp, n, hidden1, hidden2)

    latent, recon = autoencoder_forward(x, params)
    jax.block_until_ready((latent, recon))

    assert latent.shape == (batch, hidden2)
    assert recon.shape == (batch, n)
    assert bool(jnp.all(jnp.isfinite(latent))) and bool(jnp.all(jnp.isfinite(recon)))

    # TODO(synk): BatchNorm running_mean/running_var buffers are not updated
    # (pure forward only, training-mode batch statistics as in the PyTorch default).
    print("KERNEL_OK")
</pallas_src>

<mosaic_0001>
module attributes {stable_mosaic.version = 11 : i64} {
  func.func @_ae_kernel(%arg0: memref<128x128xbf16, #tpu.memory_space<vmem>>, %arg1: memref<128x128xbf16, #tpu.memory_space<vmem>>, %arg2: memref<128x128xbf16, #tpu.memory_space<vmem>>, %arg3: memref<128x128xbf16, #tpu.memory_space<vmem>>, %arg4: memref<128x128xbf16, #tpu.memory_space<vmem>>, %arg5: memref<8x128xf32, #tpu.memory_space<vmem>>, %arg6: memref<128x128xf32, #tpu.memory_space<vmem>>, %arg7: memref<128x128xf32, #tpu.memory_space<vmem>>) attributes {dimension_semantics = [], scalar_prefetch = 0 : i64, scratch_operands = 0 : i64, tpu.core_type = #tpu.core_type<tc>} {
    %c0 = arith.constant 0 : index
    %c0_0 = arith.constant 0 : index
    %0 = vector.load %arg0[%c0, %c0_0] : memref<128x128xbf16, #tpu.memory_space<vmem>>, vector<128x128xbf16>
    %c0_1 = arith.constant 0 : index
    %c0_2 = arith.constant 0 : index
    %1 = vector.load %arg5[%c0_1, %c0_2] : memref<8x128xf32, #tpu.memory_space<vmem>>, vector<1x128xf32>
    %c1 = arith.constant 1 : index
    %c0_3 = arith.constant 0 : index
    %2 = vector.load %arg5[%c1, %c0_3] : memref<8x128xf32, #tpu.memory_space<vmem>>, vector<1x128xf32>
    %c0_4 = arith.constant 0 : index
    %c0_5 = arith.constant 0 : index
    %3 = vector.load %arg1[%c0_4, %c0_5] : memref<128x128xbf16, #tpu.memory_space<vmem>>, vector<128x128xbf16>
    %cst = arith.constant dense<0.000000e+00> : vector<128x128xf32>
    %4 = tpu.matmul %0, %3, %cst {dimension_numbers = #tpu.dot_dimension_numbers<[1], [0], [0], [1], [0, 0, 1, 1], [], []>} : vector<128x128xbf16>, vector<128x128xbf16>, vector<128x128xf32> -> vector<128x128xf32>
    %cst_6 = arith.constant dense<0.000000e+00> : vector<128xf32>
    %5 = vector.multi_reduction <add>, %4, %cst_6 [0] : vector<128x128xf32> to vector<128xf32>
    %6 = vector.shape_cast %5 : vector<128xf32> to vector<1x128xf32>
    %cst_7 = arith.constant 7.812500e-03 : f32
    %7 = vector.broadcast %cst_7 : f32 to vector<1x128xf32>
    %8 = arith.mulf %6, %7 : vector<1x128xf32>
    %9 = arith.mulf %4, %4 : vector<128x128xf32>
    %cst_8 = arith.constant dense<0.000000e+00> : vector<128xf32>
    %10 = vector.multi_reduction <add>, %9, %cst_8 [0] : vector<128x128xf32> to vector<128xf32>
    %11 = vector.shape_cast %10 : vector<128xf32> to vector<1x128xf32>
    %cst_9 = arith.constant 7.812500e-03 : f32
    %12 = vector.broadcast %cst_9 : f32 to vector<1x128xf32>
    %13 = arith.mulf %11, %12 : vector<1x128xf32>
    %14 = arith.mulf %8, %8 : vector<1x128xf32>
    %15 = arith.subf %13, %14 : vector<1x128xf32>
    %cst_10 = arith.constant 0.000000e+00 : f32
    %16 = vector.broadcast %cst_10 : f32 to vector<1x128xf32>
    %17 = arith.maximumf %15, %16 : vector<1x128xf32>
    %cst_11 = arith.constant 9.99999974E-6 : f32
    %18 = vector.broadcast %cst_11 : f32 to vector<1x128xf32>
    %19 = arith.addf %17, %18 : vector<1x128xf32>
    %20 = math.rsqrt %19 : vector<1x128xf32>
    %21 = arith.mulf %1, %20 : vector<1x128xf32>
    %22 = arith.mulf %8, %21 : vector<1x128xf32>
    %23 = arith.subf %2, %22 : vector<1x128xf32>
    %24 = vector.broadcast %21 : vector<1x128xf32> to vector<128x128xf32>
    %25 = arith.mulf %4, %24 : vector<128x128xf32>
    %26 = vector.broadcast %23 : vector<1x128xf32> to vector<128x128xf32>
    %27 = arith.addf %25, %26 : vector<128x128xf32>
    %cst_12 = arith.constant 0.000000e+00 : f32
    %28 = vector.broadcast %cst_12 : f32 to vector<128x128xf32>
    %29 = arith.maximumf %27, %28 : vector<128x128xf32>
    %30 = arith.truncf %29 : vector<128x128xf32> to vector<128x128xbf16>
    %c2 = arith.constant 2 : index
    %c0_13 = arith.constant 0 : index
    %31 = vector.load %arg5[%c2, %c0_13] : memref<8x128xf32, #tpu.memory_space<vmem>>, vector<1x128xf32>
    %c3 = arith.constant 3 : index
    %c0_14 = arith.constant 0 : index
    %32 = vector.load %arg5[%c3, %c0_14] : memref<8x128xf32, #tpu.memory_space<vmem>>, vector<1x128xf32>
    %c0_15 = arith.constant 0 : index
    %c0_16 = arith.constant 0 : index
    %33 = vector.load %arg2[%c0_15, %c0_16] : memref<128x128xbf16, #tpu.memory_space<vmem>>, vector<128x128xbf16>
    %cst_17 = arith.constant dense<0.000000e+00> : vector<128x128xf32>
    %34 = tpu.matmul %30, %33, %cst_17 {dimension_numbers = #tpu.dot_dimension_numbers<[1], [0], [0], [1], [0, 0, 1, 1], [], []>} : vector<128x128xbf16>, vector<128x128xbf16>, vector<128x128xf32> -> vector<128x128xf32>
    %cst_18 = arith.constant dense<0.000000e+00> : vector<128xf32>
    %35 = vector.multi_reduction <add>, %34, %cst_18 [0] : vector<128x128xf32> to vector<128xf32>
    %36 = vector.shape_cast %35 : vector<128xf32> to vector<1x128xf32>
    %cst_19 = arith.constant 7.812500e-03 : f32
    %37 = vector.broadcast %cst_19 : f32 to vector<1x128xf32>
    %38 = arith.mulf %36, %37 : vector<1x128xf32>
    %39 = arith.mulf %34, %34 : vector<128x128xf32>
    %cst_20 = arith.constant dense<0.000000e+00> : vector<128xf32>
    %40 = vector.multi_reduction <add>, %39, %cst_20 [0] : vector<128x128xf32> to vector<128xf32>
    %41 = vector.shape_cast %40 : vector<128xf32> to vector<1x128xf32>
    %cst_21 = arith.constant 7.812500e-03 : f32
    %42 = vector.broadcast %cst_21 : f32 to vector<1x128xf32>
    %43 = arith.mulf %41, %42 : vector<1x128xf32>
    %44 = arith.mulf %38, %38 : vector<1x128xf32>
    %45 = arith.subf %43, %44 : vector<1x128xf32>
    %cst_22 = arith.constant 0.000000e+00 : f32
    %46 = vector.broadcast %cst_22 : f32 to vector<1x128xf32>
    %47 = arith.maximumf %45, %46 : vector<1x128xf32>
    %cst_23 = arith.constant 9.99999974E-6 : f32
    %48 = vector.broadcast %cst_23 : f32 to vector<1x128xf32>
    %49 = arith.addf %47, %48 : vector<1x128xf32>
    %50 = math.rsqrt %49 : vector<1x128xf32>
    %51 = arith.mulf %31, %50 : vector<1x128xf32>
    %52 = arith.mulf %38, %51 : vector<1x128xf32>
    %53 = arith.subf %32, %52 : vector<1x128xf32>
    %54 = vector.broadcast %51 : vector<1x128xf32> to vector<128x128xf32>
    %55 = arith.mulf %34, %54 : vector<128x128xf32>
    %56 = vector.broadcast %53 : vector<1x128xf32> to vector<128x128xf32>
    %57 = arith.addf %55, %56 : vector<128x128xf32>
    %cst_24 = arith.constant 0.000000e+00 : f32
    %58 = vector.broadcast %cst_24 : f32 to vector<128x128xf32>
    %59 = arith.maximumf %57, %58 : vector<128x128xf32>
    %c0_25 = arith.constant 0 : index
    %c0_26 = arith.constant 0 : index
    %60 = vector.load %arg6[%c0_25, %c0_26] : memref<128x128xf32, #tpu.memory_space<vmem>>, vector<128x128xf32>
    tpu.vector_store %arg6[%c0_25, %c0_26], %59 {strides = array<i32>} : memref<128x128xf32, #tpu.memory_space<vmem>>, vector<128x128xf32>,
    %61 = arith.truncf %59 : vector<128x128xf32> to vector<128x128xbf16>
    %c4 = arith.constant 4 : index
    %c0_27 = arith.constant 0 : index
    %62 = vector.load %arg5[%c4, %c0_27] : memref<8x128xf32, #tpu.memory_space<vmem>>, vector<1x128xf32>
    %c5 = arith.constant 5 : index
    %c0_28 = arith.constant 0 : index
    %63 = vector.load %arg5[%c5, %c0_28] : memref<8x128xf32, #tpu.memory_space<vmem>>, vector<1x128xf32>
    %c0_29 = arith.constant 0 : index
    %c0_30 = arith.constant 0 : index
    %64 = vector.load %arg3[%c0_29, %c0_30] : memref<128x128xbf16, #tpu.memory_space<vmem>>, vector<128x128xbf16>
    %cst_31 = arith.constant dense<0.000000e+00> : vector<128x128xf32>
    %65 = tpu.matmul %61, %64, %cst_31 {dimension_numbers = #tpu.dot_dimension_numbers<[1], [0], [0], [1], [0, 0, 1, 1], [], []>} : vector<128x128xbf16>, vector<128x128xbf16>, vector<128x128xf32> -> vector<128x128xf32>
    %cst_32 = arith.constant dense<0.000000e+00> : vector<128xf32>
    %66 = vector.multi_reduction <add>, %65, %cst_32 [0] : vector<128x128xf32> to vector<128xf32>
    %67 = vector.shape_cast %66 : vector<128xf32> to vector<1x128xf32>
    %cst_33 = arith.constant 7.812500e-03 : f32
    %68 = vector.broadcast %cst_33 : f32 to vector<1x128xf32>
    %69 = arith.mulf %67, %68 : vector<1x128xf32>
    %70 = arith.mulf %65, %65 : vector<128x128xf32>
    %cst_34 = arith.constant dense<0.000000e+00> : vector<128xf32>
    %71 = vector.multi_reduction <add>, %70, %cst_34 [0] : vector<128x128xf32> to vector<128xf32>
    %72 = vector.shape_cast %71 : vector<128xf32> to vector<1x128xf32>
    %cst_35 = arith.constant 7.812500e-03 : f32
    %73 = vector.broadcast %cst_35 : f32 to vector<1x128xf32>
    %74 = arith.mulf %72, %73 : vector<1x128xf32>
    %75 = arith.mulf %69, %69 : vector<1x128xf32>
    %76 = arith.subf %74, %75 : vector<1x128xf32>
    %cst_36 = arith.constant 0.000000e+00 : f32
    %77 = vector.broadcast %cst_36 : f32 to vector<1x128xf32>
    %78 = arith.maximumf %76, %77 : vector<1x128xf32>
    %cst_37 = arith.constant 9.99999974E-6 : f32
    %79 = vector.broadcast %cst_37 : f32 to vector<1x128xf32>
    %80 = arith.addf %78, %79 : vector<1x128xf32>
    %81 = math.rsqrt %80 : vector<1x128xf32>
    %82 = arith.mulf %62, %81 : vector<1x128xf32>
    %83 = arith.mulf %69, %82 : vector<1x128xf32>
    %84 = arith.subf %63, %83 : vector<1x128xf32>
    %85 = vector.broadcast %82 : vector<1x128xf32> to vector<128x128xf32>
    %86 = arith.mulf %65, %85 : vector<128x128xf32>
    %87 = vector.broadcast %84 : vector<1x128xf32> to vector<128x128xf32>
    %88 = arith.addf %86, %87 : vector<128x128xf32>
    %cst_38 = arith.constant 0.000000e+00 : f32
    %89 = vector.broadcast %cst_38 : f32 to vector<128x128xf32>
    %90 = arith.maximumf %88, %89 : vector<128x128xf32>
    %91 = arith.truncf %90 : vector<128x128xf32> to vector<128x128xbf16>
    %c0_39 = arith.constant 0 : index
    %c0_40 = arith.constant 0 : index
    %92 = vector.load %arg4[%c0_39, %c0_40] : memref<128x128xbf16, #tpu.memory_space<vmem>>, vector<128x128xbf16>
    %cst_41 = arith.constant dense<0.000000e+00> : vector<128x128xf32>
    %93 = tpu.matmul %91, %92, %cst_41 {dimension_numbers = #tpu.dot_dimension_numbers<[1], [0], [0], [1], [0, 0, 1, 1], [], []>} : vector<128x128xbf16>, vector<128x128xbf16>, vector<128x128xf32> -> vector<128x128xf32>
    %c6 = arith.constant 6 : index
    %c0_42 = arith.constant 0 : index
    %94 = vector.load %arg5[%c6, %c0_42] : memref<8x128xf32, #tpu.memory_space<vmem>>, vector<1x128xf32>
    %95 = vector.broadcast %94 : vector<1x128xf32> to vector<128x128xf32>
    %96 = arith.addf %93, %95 : vector<128x128xf32>
    %c0_43 = arith.constant 0 : index
    %c0_44 = arith.constant 0 : index
    %97 = vector.load %arg7[%c0_43, %c0_44] : memref<128x128xf32, #tpu.memory_space<vmem>>, vector<128x128xf32>
    tpu.vector_store %arg7[%c0_43, %c0_44], %96 {strides = array<i32>} : memref<128x128xf32, #tpu.memory_space<vmem>>, vector<128x128xf32>,
    return
  }
}

</mosaic_0001>

<bundles_post_ra>
// kernel: tpu_custom_call.1
= control target key start
LH: loop header
LB: loop body
LE: loop exit
PB: predicated region body
PF: predicated region fallthrough
CT: control target
= control target key end

     0   :  { %13 = vsyncpa [#allocation3], 0  ;;  %s2219_s0 = inlined_call_operand.hbm [shape: bf16[128,128], index: 0, kind: input, shape index: {}]   ;;  %s2220_s1 = inlined_call_operand.hbm [shape: bf16[128,128], index: 1, kind: input, shape index: {}]   ;;  %s2221_s2 = inlined_call_operand.hbm [shape: bf16[128,128], index: 2, kind: input, shape index: {}]   ;;  %s2222_s3 = inlined_call_operand.hbm [shape: bf16[128,128], index: 3, kind: input, shape index: {}]   ;;  %s2223_s4 = inlined_call_operand.hbm [shape: bf16[128,128], index: 4, kind: input, shape index: {}]   ;;  %s2224_s5 = inlined_call_operand.vmem [shape: f32[8,128], index: 5, kind: input, shape index: {}]   ;;  %s2225_s6 = inlined_call_operand.hbm [shape: f32[128,128], index: 6, kind: output, shape index: {0}]   ;;  %s2226_s7 = inlined_call_operand.hbm [shape: f32[128,128], index: 7, kind: output, shape index: {1}]  }
   0x1   :  { %14 = vsyncpa [#allocation6], 0 }
   0x2   :  { %15 = vsyncpa [#allocation9], 0 }
   0x3   :  { %16 = vsyncpa [#allocation4], 0 }
   0x4   :  { %17 = vsyncpa [#allocation13], 0  ;;  %s1732_s24 = smov [#allocation5]   ;;  %s1733_s26 = smov [#allocation8]  }
   0x5   :  { %s35_s25 = sshll.u32 %s1732_s24, 4  ;;  %s59_s27 = sshll.u32 %s1733_s26, 4  ;;  %s36_s25 = int_to_ptr.vmem [resolvable:$true] %s35_s25  ;;  %s1783_s27 = int_to_ptr.vmem [resolvable:$true] %s59_s27 }
   0x6   :  { %s1568_s30 = scalar_lea.hbm %s2220_s1, 1024 }
   0x7   :  { %p1569_p0 = scmp.ne.s32.totalorder %s2220_s1, %s1568_s30  ;;  %p1572_p1 = scmp.lt.u32.totalorder %s1568_s30, %s2220_s1 }
   0x9   :  { %p1574_p2 = pnand %p1572_p1, %p1569_p0 }
   0xb   :  { %1577 = shalt.err (!%p1574_p2)
}
   0xc   :  { %s1578_s12 = scalar_lea.vmem %s36_s25, 1024  ;;  %p1583_p4 = scmp.lt.s32.totalorder %s36_s25, %s36_s25 }
   0xd   :  { %p1579_p3 = scmp.ne.s32.totalorder %s36_s25, %s1578_s12  ;;  %p1584_p5 = scmp.lt.s32.totalorder %s1578_s12, %s1578_s12 }
   0xf   :  { %p1585_p6 = por %p1584_p5, %p1583_p4 }
  0x11   :  { %p1586_p7 = pnand %p1585_p6, %p1579_p3 }
  0x13   :  { %1589 = shalt.err (!%p1586_p7)
}
  0x14   :  { %s1734_s13 = smov 64   ;;  %s1735_s14 = smov 4  }
  0x15   :  { %41 = dma.hbm_to_vmem [thread:$0]  %s2220_s1, 1024, %s36_s25, [#allocation6], %s1734_s13, %s1734_s13, %s1735_s14  }
  0x16   :  { %s1590_s19 = scalar_lea.hbm %s2222_s3, 1024 }
  0x17   :  { %p1591_p8 = scmp.ne.s32.totalorder %s2222_s3, %s1590_s19  ;;  %p1594_p9 = scmp.lt.u32.totalorder %s1590_s19, %s2222_s3 }
  0x19   :  { %p1596_p10 = pnand %p1594_p9, %p1591_p8 }
  0x1b   :  { %1599 = shalt.err (!%p1596_p10)
}
  0x1c   :  { %s1600_s24 = scalar_lea.vmem %s1783_s27, 1024  ;;  %p1605_p12 = scmp.lt.s32.totalorder %s1783_s27, %s1783_s27 }
  0x1d   :  { %p1601_p11 = scmp.ne.s32.totalorder %s1783_s27, %s1600_s24  ;;  %p1606_p13 = scmp.lt.s32.totalorder %s1600_s24, %s1600_s24 }
  0x1f   :  { %p1607_p0 = por %p1606_p13, %p1605_p12 }
  0x21   :  { %p1608_p1 = pnand %p1607_p0, %p1601_p11 }
  0x23   :  { %1611 = shalt.err (!%p1608_p1)
}
  0x24   :  { %65 = dma.hbm_to_vmem [thread:$0]  %s2222_s3, 1024, %s1783_s27, [#allocation9], %s1734_s13, %s1734_s13, %s1735_s14  }
  0x25   :  { %s1736_s26 = smov [#allocation2]   ;;  %s1737_s29 = smov [#allocation7]  }
  0x26   :  { %s23_s28 = sshll.u32 %s1736_s26, 4  ;;  %s47_s30 = sshll.u32 %s1737_s29, 4  ;;  %s24_s28 = int_to_ptr.vmem [resolvable:$true] %s23_s28  ;;  %s1820_s30 = int_to_ptr.vmem [resolvable:$true] %s47_s30 }
  0x27   :  { %s1612_s10 = scalar_lea.hbm %s2219_s0, 1024 }
  0x28   :  { %p1613_p2 = scmp.ne.s32.totalorder %s2219_s0, %s1612_s10  ;;  %p1616_p3 = scmp.lt.u32.totalorder %s1612_s10, %s2219_s0 }
  0x2a   :  { %p1618_p4 = pnand %p1616_p3, %p1613_p2 }
  0x2c   :  { %1621 = shalt.err (!%p1618_p4)
}
  0x2d   :  { %s1622_s3 = scalar_lea.vmem %s24_s28, 1024  ;;  %p1627_p6 = scmp.lt.s32.totalorder %s24_s28, %s24_s28 }
  0x2e   :  { %p1623_p5 = scmp.ne.s32.totalorder %s24_s28, %s1622_s3  ;;  %p1628_p7 = scmp.lt.s32.totalorder %s1622_s3, %s1622_s3 }
  0x30   :  { %p1629_p8 = por %p1628_p7, %p1627_p6 }
  0x32   :  { %p1630_p9 = pnand %p1629_p8, %p1623_p5 }
  0x34   :  { %1633 = shalt.err (!%p1630_p9)
}
  0x35   :  { %29 = dma.hbm_to_vmem [thread:$0]  %s2219_s0, 1024, %s24_s28, [#allocation3], %s1734_s13, %s1734_s13, %s1735_s14  }
  0x36   :  { %s1634_s20 = scalar_lea.hbm %s2221_s2, 1024 }
  0x37   :  { %p1635_p10 = scmp.ne.s32.totalorder %s2221_s2, %s1634_s20  ;;  %p1638_p11 = scmp.lt.u32.totalorder %s1634_s20, %s2221_s2 }
  0x39   :  { %p1640_p12 = pnand %p1638_p11, %p1635_p10 }
  0x3b   :  { %1643 = shalt.err (!%p1640_p12)
}
  0x3c   :  { %s1644_s1 = scalar_lea.vmem %s1820_s30, 1024  ;;  %p1649_p0 = scmp.lt.s32.totalorder %s1820_s30, %s1820_s30 }
  0x3d   :  { %p1645_p13 = scmp.ne.s32.totalorder %s1820_s30, %s1644_s1  ;;  %p1650_p1 = scmp.lt.s32.totalorder %s1644_s1, %s1644_s1 }
  0x3f   :  { %p1651_p2 = por %p1650_p1, %p1649_p0 }
  0x41   :  { %p1652_p3 = pnand %p1651_p2, %p1645_p13 }
  0x43   :  { %1655 = shalt.err (!%p1652_p3)
}
  0x44   :  { %53 = dma.hbm_to_vmem [thread:$0]  %s2221_s2, 1024, %s1820_s30, [#allocation6], %s1734_s13, %s1734_s13, %s1735_s14  }
  0x45   :  { %s1738_s26 = smov [#allocation10]   ;;  %s1656_s9 = scalar_lea.hbm %s2223_s4, 1024 }
  0x46   :  { %s71_s28 = sshll.u32 %s1738_s26, 4  ;;  %p1657_p4 = scmp.ne.s32.totalorder %s2223_s4, %s1656_s9  ;;  %s72_s28 = int_to_ptr.vmem [resolvable:$true] %s71_s28 }
  0x47   :  { %p1660_p5 = scmp.lt.u32.totalorder %s1656_s9, %s2223_s4 }
  0x49   :  { %p1662_p6 = pnand %p1660_p5, %p1657_p4 }
  0x4b   :  { %1665 = shalt.err (!%p1662_p6)
}
  0x4c   :  { %s1666_s16 = scalar_lea.vmem %s72_s28, 1024  ;;  %p1671_p8 = scmp.lt.s32.totalorder %s72_s28, %s72_s28 }
  0x4d   :  { %p1667_p7 = scmp.ne.s32.totalorder %s72_s28, %s1666_s16  ;;  %p1672_p9 = scmp.lt.s32.totalorder %s1666_s16, %s1666_s16 }
  0x4f   :  { %p1673_p10 = por %p1672_p9, %p1671_p8 }
  0x51   :  { %p1674_p11 = pnand %p1673_p10, %p1667_p7 }
  0x53   :  { %1677 = shalt.err (!%p1674_p11)
}
  0x54   :  { %77 = dma.hbm_to_vmem [thread:$0]  %s2223_s4, 1024, %s72_s28, [#allocation9], %s1734_s13, %s1734_s13, %s1735_s14  }
  0x55   :  { %1722 = dma.done.wait [#allocation3], 1024  }
  0x56   :  { %1723 = vsyncadd [#allocation3], 4294966272 }
  0x57   :  { %1724 = dma.done.wait [#allocation6], 2048  }
  0x58   :  { %1725 = vsyncadd [#allocation6], 4294965248 }
  0x59   :  { %1726 = dma.done.wait [#allocation9], 2048  }
  0x5a   :  { %1727 = vsyncadd [#allocation9], 4294965248  ;;  %v1522_v0 = vld [vmem:[#allocation5] sm:$0xff]   ;;  %v1523_v1 = vld [vmem:[#allocation5 + $0x8] sm:$0xff]   ;;  %s1739_s24 = smov [#allocation11]  }
  0x5b   :  { %1383 = vmatprep.subr.bf16.mxu0 %v1522_v0  ;;  %v1524_v2 = vld [vmem:[#allocation5 + $0x10] sm:$0xff]   ;;  %v1525_v3 = vld [vmem:[#allocation5 + $0x18] sm:$0xff]   ;;  %v1530_v4 = vld [vmem:[#allocation2] sm:$0xff]   ;;  %s1248_s1 = sshll.u32 %s1739_s24, 4  ;;  %s1249_s1 = int_to_ptr.vmem [resolvable:$true] %s1248_s1 }
  0x5c   :  { %1384 = vmatpush3.bf16.msra.mxu0 %v1522_v0  ;;  %1399 = vmatprep.mubr.bf16.mxu0 %v1530_v4  ;;  %v1526_v5 = vld [vmem:[#allocation5 + $0x20] sm:$0xff]   ;;  %v1527_v6 = vld [vmem:[#allocation5 + $0x28] sm:$0xff]   ;;  %v1528_v7 = vld [vmem:[#allocation5 + $0x30] sm:$0xff]   ;;  %s1678_s0 = scalar_lea.vmem %s1249_s1, 2048  ;;  %p1683_p13 = scmp.lt.s32.totalorder %s1249_s1, %s1249_s1 }
  0x5d   :  { %1385 = vmatprep.subr.bf16.mxu0 %v1523_v1  ;;  %v1529_v8 = vld [vmem:[#allocation5 + $0x38] sm:$0xff]   ;;  %v1531_v9 = vld [vmem:[#allocation2 + $0x8] sm:$0xff]   ;;  %v1532_v10 = vld [vmem:[#allocation2 + $0x10] sm:$0xff]   ;;  %p1679_p12 = scmp.ne.s32.totalorder %s1249_s1, %s1678_s0  ;;  %p1684_p0 = scmp.lt.s32.totalorder %s1678_s0, %s1678_s0 }
  0x5e   :  { %v1533_v11 = vld [vmem:[#allocation2 + $0x18] sm:$0xff]   ;;  %v1534_v12 = vld [vmem:[#allocation2 + $0x20] sm:$0xff]   ;;  %v1535_v13 = vld [vmem:[#allocation2 + $0x28] sm:$0xff]  }
  0x5f   :  { %v1536_v14 = vld [vmem:[#allocation2 + $0x30] sm:$0xff]   ;;  %v1537_v15 = vld [vmem:[#allocation2 + $0x38] sm:$0xff]   ;;  %v1538_v16 = vld [vmem:[#allocation7] sm:$0xff]   ;;  %p1685_p1 = por %p1684_p0, %p1683_p13 }
  0x60   :  { %1386 = vmatpush3.bf16.msra.mxu0 %v1523_v1  ;;  %1415 = vmatprep.subr.bf16.mxu1 %v1538_v16  ;;  %v1539_v17 = vld [vmem:[#allocation7 + $0x8] sm:$0xff]   ;;  %v1540_v18 = vld [vmem:[#allocation7 + $0x10] sm:$0xff]   ;;  %v1541_v19 = vld [vmem:[#allocation7 + $0x18] sm:$0xff]  }
  0x61   :  { %1387 = vmatprep.subr.bf16.mxu0 %v1524_v2  ;;  %1416 = vmatpush3.bf16.msra.mxu1 %v1538_v16  ;;  %v1542_v20 = vld [vmem:[#allocation7 + $0x20] sm:$0xff]   ;;  %v1543_v21 = vld [vmem:[#allocation7 + $0x28] sm:$0xff]   ;;  %v1544_v22 = vld [vmem:[#allocation7 + $0x30] sm:$0xff]   ;;  %p1686_p2 = pnand %p1685_p1, %p1679_p12 }
  0x62   :  { %1417 = vmatprep.subr.bf16.mxu1 %v1539_v17  ;;  %v1545_v23 = vld [vmem:[#allocation7 + $0x38] sm:$0xff]  }
  0x64   :  { %1388 = vmatpush3.bf16.msra.mxu0 %v1524_v2 }
  0x65   :  { %1389 = vmatprep.subr.bf16.mxu0 %v1525_v3  ;;  %1418 = vmatpush3.bf16.msra.mxu1 %v1539_v17 }
  0x66   :  { %1419 = vmatprep.subr.bf16.mxu1 %v1540_v18 }
  0x68   :  { %1390 = vmatpush3.bf16.msra.mxu0 %v1525_v3 }
  0x69   :  { %1391 = vmatprep.subr.bf16.mxu0 %v1526_v5  ;;  %1420 = vmatpush3.bf16.msra.mxu1 %v1540_v18 }
  0x6a   :  { %1421 = vmatprep.subr.bf16.mxu1 %v1541_v19 }
  0x6c   :  { %1392 = vmatpush3.bf16.msra.mxu0 %v1526_v5 }
  0x6d   :  { %1393 = vmatprep.subr.bf16.mxu0 %v1527_v6  ;;  %1422 = vmatpush3.bf16.msra.mxu1 %v1541_v19 }
  0x6e   :  { %1423 = vmatprep.subr.bf16.mxu1 %v1542_v20 }
  0x70   :  { %1394 = vmatpush3.bf16.msra.mxu0 %v1527_v6 }
  0x71   :  { %1395 = vmatprep.subr.bf16.mxu0 %v1528_v7  ;;  %1424 = vmatpush3.bf16.msra.mxu1 %v1542_v20 }
  0x72   :  { %1425 = vmatprep.subr.bf16.mxu1 %v1543_v21 }
  0x74   :  { %1396 = vmatpush3.bf16.msra.mxu0 %v1528_v7 }
  0x75   :  { %1397 = vmatprep.subr.bf16.mxu0 %v1529_v8  ;;  %1426 = vmatpush3.bf16.msra.mxu1 %v1543_v21 }
  0x76   :  { %1427 = vmatprep.subr.bf16.mxu1 %v1544_v22 }
  0x78   :  { %1398 = vmatpush3.bf16.msra.mxu0 %v1529_v8 }
  0x79   :  { %1428 = vmatpush3.bf16.msra.mxu1 %v1544_v22 }
  0x7a   :  { %1429 = vmatprep.subr.bf16.mxu1 %v1545_v23 }
  0x7b   :  { %1400 = vmatmul.mubr.bf16.vlgmr.msra.gmra.mrb[0].mxu0 %v1531_v9 }
  0x7c   :  { %1403 = vmatprep.mubr.bf16.mxu0 %v1532_v10 }
  0x7d   :  { %1430 = vmatpush3.bf16.msra.mxu1 %v1545_v23 }
  0x83   :  { %1404 = vmatmul.mubr.bf16.gmra.mrb[4].mxu0 %v1533_v11 }
  0x84   :  { %1407 = vmatprep.mubr.bf16.mxu0 %v1534_v12 }
  0x8b   :  { %1408 = vmatmul.mubr.bf16.gmra.mrb[8].mxu0 %v1535_v13 }
  0x8c   :  { %1411 = vmatprep.mubr.bf16.mxu0 %v1536_v14 }
  0x93   :  { %1412 = vmatmul.mubr.bf16.gmra.mrb[12].mxu0 %v1537_v15 }
 0x14e   :  { %v1872_v24 = vpop.f32.mrb[0].mxu0 }
 0x14f   :  { %v1874_v25 = vpop.f32.mrb[1].mxu0  ;;  %v347_v31 = vmul.f32 %v1872_v24, %v1872_v24 }
 0x150   :  { %v1876_v26 = vpop.f32.mrb[2].mxu0  ;;  %v345_v28 = vmul.f32 %v1874_v25, %v1874_v25 }
 0x151   :  { %v1878_v27 = vpop.f32.mrb[3].mxu0  ;;  %v348_v34 = vmul.f32 %v1876_v26, %v1876_v26 }
 0x152   :  { %v323_v29 = vadd.f32 %v1878_v27, %v1874_v25  ;;  %v346_v30 = vmul.f32 %v1878_v27, %v1878_v27 }
 0x154   :  { %v324_v32 = vadd.f32 %v1872_v24, %v323_v29  ;;  %v361_v33 = vadd.f32 %v346_v30, %v345_v28 }
 0x156   :  { %v362_v35 = vadd.f32 %v361_v33, %v347_v31  ;;  %v1891_v36 = vpop.f32.mrb[4].mxu0  ;;  %v325_v37 = vadd.f32 %v1876_v26, %v324_v32 }
 0x157   :  { %v1894_v38 = vpop.f32.mrb[5].mxu0  ;;  %v351_v47 = vmul.f32 %v1891_v36, %v1891_v36 }
 0x158   :  { %v326_v39 = vadd.f32 %v325_v37, %v1894_v38  ;;  %v349_v40 = vmul.f32 %v1894_v38, %v1894_v38  ;;  %v363_v41 = vadd.f32 %v362_v35, %v348_v34  ;;  %v1899_v42 = vpop.f32.mrb[6].mxu0 }
 0x159   :  { %v1901_v43 = vpop.f32.mrb[7].mxu0  ;;  %v352_v50 = vmul.f32 %v1899_v42, %v1899_v42 }
 0x15a   :  { %v364_v44 = vadd.f32 %v363_v41, %v349_v40  ;;  %v327_v45 = vadd.f32 %v326_v39, %v1901_v43  ;;  %v350_v46 = vmul.f32 %v1901_v43, %v1901_v43 }
 0x15c   :  { %v328_v48 = vadd.f32 %v1891_v36, %v327_v45  ;;  %v365_v49 = vadd.f32 %v364_v44, %v350_v46 }
 0x15e   :  { %v366_v51 = vadd.f32 %v365_v49, %v351_v47  ;;  %v1911_v52 = vpop.f32.mrb[8].mxu0  ;;  %v329_v53 = vadd.f32 %v1899_v42, %v328_v48  ;;  %v391_v48 = vlaneseq }
 0x15f   :  { %v1914_v54 = vpop.f32.mrb[9].mxu0  ;;  %v355_v63 = vmul.f32 %v1911_v52, %v1911_v52 }
 0x160   :  { %v330_v55 = vadd.f32 %v329_v53, %v1914_v54  ;;  %v353_v56 = vmul.f32 %v1914_v54, %v1914_v54  ;;  %v367_v57 = vadd.f32 %v366_v51, %v352_v50  ;;  %v1919_v58 = vpop.f32.mrb[10].mxu0  ;;  %v392_v49 = vshrl.u32 %v391_v48, 7  ;;  %v112_v50 = vld [vmem:[%s2224_s5] sm:$0x1] }
 0x161   :  { %v1921_v59 = vpop.f32.mrb[11].mxu0  ;;  %v356_v2 = vmul.f32 %v1919_v58, %v1919_v58 }
 0x162   :  { %v368_v60 = vadd.f32 %v367_v57, %v353_v56  ;;  %v331_v61 = vadd.f32 %v330_v55, %v1921_v59  ;;  %v354_v62 = vmul.f32 %v1921_v59, %v1921_v59  ;;  %v1945_v51 = vsub.s32 0, %v392_v49  ;;  %v113_v56 = vld [vmem:[%s2224_s5 + $0x1] sm:$0x1] }
 0x164   :  { %v332_v0 = vadd.f32 %v1911_v52, %v331_v61  ;;  %v369_v1 = vadd.f32 %v368_v60, %v354_v62 }
 0x166   :  { %v370_v3 = vadd.f32 %v369_v1, %v355_v63  ;;  %v1931_v4 = vpop.f32.mrb[12].mxu0  ;;  %v333_v5 = vadd.f32 %v1919_v58, %v332_v0 }
 0x167   :  { %v308_v6 = vpop.f32.mrb[13].mxu0  ;;  %v359_v15 = vmul.f32 %v1931_v4, %v1931_v4 }
 0x168   :  { %v334_v7 = vadd.f32 %v333_v5, %v308_v6  ;;  %v357_v8 = vmul.f32 %v308_v6, %v308_v6  ;;  %v371_v9 = vadd.f32 %v370_v3, %v356_v2  ;;  %v1934_v10 = vpop.f32.mrb[14].mxu0 }
 0x169   :  { %v311_v11 = vpop.f32.mrb[15].mxu0  ;;  %v360_v18 = vmul.f32 %v1934_v10, %v1934_v10 }
 0x16a   :  { %v372_v12 = vadd.f32 %v371_v9, %v357_v8  ;;  %v335_v13 = vadd.f32 %v334_v7, %v311_v11  ;;  %v358_v14 = vmul.f32 %v311_v11, %v311_v11 }
 0x16c   :  { %v336_v16 = vadd.f32 %v1931_v4, %v335_v13  ;;  %v373_v17 = vadd.f32 %v372_v12, %v358_v14 }
 0x16e   :  { %v337_v19 = vadd.f32 %v1934_v10, %v336_v16  ;;  %v374_v20 = vadd.f32 %v373_v17, %v359_v15 }
 0x170   :  { %v338_v21 = vrot.slane %v337_v19, 4  ;;  %v375_v22 = vadd.f32 %v374_v20, %v360_v18 }
 0x172   :  { %v339_v23 = vadd.f32 %v338_v21, %v337_v19  ;;  %v376_v28 = vrot.slane %v375_v22, 4 }
 0x174   :  { %v340_v29 = vrot.slane %v339_v23, 2  ;;  %v377_v30 = vadd.f32 %v376_v28, %v375_v22 }
 0x176   :  { %v341_v31 = vadd.f32 %v340_v29, %v339_v23  ;;  %v378_v32 = vrot.slane %v377_v30, 2 }
 0x178   :  { %v342_v33 = vrot.slane %v341_v31, 1  ;;  %v379_v34 = vadd.f32 %v378_v32, %v377_v30 }
 0x17a   :  { %v343_v35 = vadd.f32 %v342_v33, %v341_v31  ;;  %v380_v37 = vrot.slane %v379_v34, 1 }
 0x17c   :  { %v344_v39 = vmul.f32 0.0078125, %v343_v35  ;;  %v381_v40 = vadd.f32 %v380_v37, %v379_v34 }
 0x17e   :  { %v382_v41 = vmul.f32 0.0078125, %v381_v40  ;;  %v383_v44 = vmul.f32 %v344_v39, %v344_v39 }
 0x180   :  { %v384_v45 = vsub.f32 %v382_v41, %v383_v44 }
 0x182   :  { %v385_v46 = vmax.f32 %v384_v45, 0.0 }
 0x184   :  { %v386_v47 = vadd.f32 1e-05, %v385_v46 }
 0x186   :  { %1562 = vrsqrt.f32 %v386_v47 }
 0x190   :  { %v1563_v53 = vpop.eup %1562 }
 0x191   :  { %v388_v55 = vmul.f32 %v1563_v53, %v112_v50 }
 0x193   :  { %v389_v57 = vmul.f32 %v388_v55, %v344_v39  ;;  %v394_v60 = vrot.slane %v388_v55, %v1945_v51 }
 0x195   :  { %v390_v61 = vsub.f32 %v113_v56, %v389_v57  ;;  %v408_v62 = vmul.f32 %v394_v60, %v311_v11  ;;  %v395_v63 = vmul.f32 %v394_v60, %v1874_v25  ;;  %v396_v0 = vmul.f32 %v394_v60, %v1878_v27  ;;  %v1546_v56 = vld [vmem:[#allocation8] sm:$0xff]   ;;  %v1548_v57 = vld [vmem:[#allocation8 + $0x10] sm:$0xff]  }
 0x196   :  { %v397_v1 = vmul.f32 %v1872_v24, %v394_v60  ;;  %v398_v2 = vmul.f32 %v1876_v26, %v394_v60  ;;  %v399_v3 = vmul.f32 %v394_v60, %v1894_v38  ;;  %v400_v5 = vmul.f32 %v394_v60, %v1901_v43  ;;  %1447 = vmatprep.subr.bf16.mxu0 %v1546_v56 }
 0x197   :  { %v414_v7 = vrot.slane %v390_v61, %v1945_v51  ;;  %v401_v8 = vmul.f32 %v1891_v36, %v394_v60  ;;  %v402_v9 = vmul.f32 %v1899_v42, %v394_v60  ;;  %v403_v11 = vmul.f32 %v394_v60, %v1914_v54  ;;  %1448 = vmatpush3.bf16.msra.mxu0 %v1546_v56  ;;  %v1551_v61 = vld [vmem:[#allocation8 + $0x28] sm:$0xff]  }
 0x198   :  { %v404_v25 = vmul.f32 %v394_v60, %v1921_v59  ;;  %v405_v27 = vmul.f32 %v1911_v52, %v394_v60  ;;  %v406_v24 = vmul.f32 %v1919_v58, %v394_v60  ;;  %v407_v12 = vmul.f32 %v394_v60, %v308_v6 }
 0x199   :  { %v428_v26 = vadd.f32 %v414_v7, %v408_v62  ;;  %v415_v13 = vadd.f32 %v414_v7, %v395_v63  ;;  %v416_v38 = vadd.f32 %v414_v7, %v396_v0  ;;  %v417_v14 = vadd.f32 %v414_v7, %v397_v1  ;;  %v1552_v62 = vld [vmem:[#allocation8 + $0x30] sm:$0xff]   ;;  %v1553_v63 = vld [vmem:[#allocation8 + $0x38] sm:$0xff]  }
 0x19a   :  { %v418_v43 = vadd.f32 %v414_v7, %v398_v2  ;;  %v419_v15 = vadd.f32 %v414_v7, %v399_v3  ;;  %v420_v16 = vadd.f32 %v414_v7, %v400_v5  ;;  %v421_v17 = vadd.f32 %v414_v7, %v401_v8 }
 0x19b   :  { %v431_v36 = vmax.f32 %v415_v13, 0.0  ;;  %v432_v18 = vmax.f32 %v416_v38, 0.0  ;;  %v433_v42 = vmax.f32 %v417_v14, 0.0  ;;  %v422_v19 = vadd.f32 %v414_v7, %v402_v9 }
 0x19c   :  { %v434_v54 = vmax.f32 %v418_v43, 0.0  ;;  %v435_v20 = vmax.f32 %v419_v15, 0.0  ;;  %v436_v59 = vmax.f32 %v420_v16, 0.0  ;;  %v437_v21 = vmax.f32 %v421_v17, 0.0 }
 0x19d   :  { %v447_v52 = vpack.c.bf16 %v432_v18, %v431_v36  ;;  %v438_v22 = vmax.f32 %v422_v19, 0.0  ;;  %v423_v58 = vadd.f32 %v414_v7, %v403_v11  ;;  %v424_v6 = vadd.f32 %v414_v7, %v404_v25 }
 0x19e   :  { %v448_v23 = vpack.c.bf16 %v434_v54, %v433_v42  ;;  %v449_v28 = vpack.c.bf16 %v436_v59, %v435_v20  ;;  %v425_v29 = vadd.f32 %v414_v7, %v405_v27  ;;  %v426_v30 = vadd.f32 %v414_v7, %v406_v24 }
 0x19f   :  { %1431 = vmatprep.mubr.bf16.mxu1 %v447_v52  ;;  %v450_v31 = vpack.c.bf16 %v438_v22, %v437_v21  ;;  %v439_v32 = vmax.f32 %v423_v58, 0.0  ;;  %v440_v33 = vmax.f32 %v424_v6, 0.0  ;;  %v427_v34 = vadd.f32 %v414_v7, %v407_v12 }
 0x1a0   :  { %1432 = vmatmul.mubr.bf16.vlgmr.msra.gmra.mrb[0].mxu1 %v448_v23  ;;  %v441_v35 = vmax.f32 %v425_v29, 0.0  ;;  %v442_v37 = vmax.f32 %v426_v30, 0.0  ;;  %v444_v39 = vmax.f32 %v428_v26, 0.0  ;;  %v409_v40 = vmul.f32 %v1931_v4, %v394_v60  ;;  %v1547_v4 = vld [vmem:[#allocation8 + $0x8] sm:$0xff]  }
 0x1a1   :  { %1435 = vmatprep.mubr.bf16.mxu1 %v449_v28  ;;  %v451_v41 = vpack.c.bf16 %v440_v33, %v439_v32  ;;  %v443_v44 = vmax.f32 %v427_v34, 0.0  ;;  %v410_v45 = vmul.f32 %v1934_v10, %v394_v60  ;;  %1449 = vmatprep.subr.bf16.mxu0 %v1547_v4  ;;  %v1549_v10 = vld [vmem:[#allocation8 + $0x18] sm:$0xff]   ;;  %v1550_v60 = vld [vmem:[#allocation8 + $0x20] sm:$0xff]  }
 0x1a2   :  { %v452_v46 = vpack.c.bf16 %v442_v37, %v441_v35  ;;  %v429_v47 = vadd.f32 %v414_v7, %v409_v40  ;;  %1450 = vmatpush3.bf16.msra.mxu0 %v1547_v4 }
 0x1a3   :  { %v453_v48 = vpack.c.bf16 %v444_v39, %v443_v44  ;;  %v430_v49 = vadd.f32 %v414_v7, %v410_v45  ;;  %1451 = vmatprep.subr.bf16.mxu0 %v1548_v57 }
 0x1a4   :  { %v445_v50 = vmax.f32 %v429_v47, 0.0 }
 0x1a5   :  { %v446_v53 = vmax.f32 %v430_v49, 0.0 }
 0x1a6   :  { %1452 = vmatpush3.bf16.msra.mxu0 %v1548_v57 }
 0x1a7   :  { %v454_v55 = vpack.c.bf16 %v446_v53, %v445_v50  ;;  %1453 = vmatprep.subr.bf16.mxu0 %v1549_v10 }
 0x1a8   :  { %1436 = vmatmul.mubr.bf16.gmra.mrb[4].mxu1 %v450_v31 }
 0x1a9   :  { %1439 = vmatprep.mubr.bf16.mxu1 %v451_v41 }
 0x1aa   :  { %1454 = vmatpush3.bf16.msra.mxu0 %v1549_v10 }
 0x1ab   :  { %1455 = vmatprep.subr.bf16.mxu0 %v1550_v60 }
 0x1ae   :  { %1456 = vmatpush3.bf16.msra.mxu0 %v1550_v60 }
 0x1af   :  { %1457 = vmatprep.subr.bf16.mxu0 %v1551_v61 }
 0x1b0   :  { %1440 = vmatmul.mubr.bf16.gmra.mrb[8].mxu1 %v452_v46 }
 0x1b1   :  { %1443 = vmatprep.mubr.bf16.mxu1 %v453_v48 }
 0x1b2   :  { %1458 = vmatpush3.bf16.msra.mxu0 %v1551_v61 }
 0x1b3   :  { %1459 = vmatprep.subr.bf16.mxu0 %v1552_v62 }
 0x1b6   :  { %1460 = vmatpush3.bf16.msra.mxu0 %v1552_v62 }
 0x1b7   :  { %1461 = vmatprep.subr.bf16.mxu0 %v1553_v63 }
 0x1b8   :  { %1444 = vmatmul.mubr.bf16.gmra.mrb[12].mxu1 %v454_v55 }
 0x1ba   :  { %1462 = vmatpush3.bf16.msra.mxu0 %v1553_v63 }
 0x273   :  { %v1966_v0 = vpop.f32.mrb[0].mxu1 }
 0x274   :  { %v1968_v1 = vpop.f32.mrb[1].mxu1  ;;  %v642_v9 = vmul.f32 %v1966_v0, %v1966_v0 }
 0x275   :  { %v1970_v2 = vpop.f32.mrb[2].mxu1  ;;  %v640_v5 = vmul.f32 %v1968_v1, %v1968_v1 }
 0x276   :  { %v1972_v3 = vpop.f32.mrb[3].mxu1  ;;  %v643_v27 = vmul.f32 %v1970_v2, %v1970_v2 }
 0x277   :  { %v618_v7 = vadd.f32 %v1972_v3, %v1968_v1  ;;  %v641_v8 = vmul.f32 %v1972_v3, %v1972_v3 }
 0x279   :  { %v619_v11 = vadd.f32 %v1966_v0, %v618_v7  ;;  %v656_v25 = vadd.f32 %v641_v8, %v640_v5 }
 0x27b   :  { %v657_v24 = vadd.f32 %v656_v25, %v642_v9  ;;  %v1985_v12 = vpop.f32.mrb[4].mxu1  ;;  %v620_v26 = vadd.f32 %v1970_v2, %v619_v11 }
 0x27c   :  { %v1988_v13 = vpop.f32.mrb[5].mxu1  ;;  %v646_v42 = vmul.f32 %v1985_v12, %v1985_v12 }
 0x27d   :  { %v621_v38 = vadd.f32 %v620_v26, %v1988_v13  ;;  %v644_v14 = vmul.f32 %v1988_v13, %v1988_v13  ;;  %v658_v43 = vadd.f32 %v657_v24, %v643_v27  ;;  %v1993_v15 = vpop.f32.mrb[6].mxu1 }
 0x27e   :  { %v1995_v16 = vpop.f32.mrb[7].mxu1  ;;  %v647_v20 = vmul.f32 %v1993_v15, %v1993_v15 }
 0x27f   :  { %v659_v17 = vadd.f32 %v658_v43, %v644_v14  ;;  %v622_v36 = vadd.f32 %v621_v38, %v1995_v16  ;;  %v645_v18 = vmul.f32 %v1995_v16, %v1995_v16 }
 0x281   :  { %v623_v19 = vadd.f32 %v1985_v12, %v622_v36  ;;  %v660_v54 = vadd.f32 %v659_v17, %v645_v18 }
 0x283   :  { %v661_v59 = vadd.f32 %v660_v54, %v646_v42  ;;  %v2005_v21 = vpop.f32.mrb[8].mxu1  ;;  %v624_v52 = vadd.f32 %v1993_v15, %v623_v19  ;;  %v455_v54 = vld [vmem:[%s2224_s5 + $0x2] sm:$0x1] }
 0x284   :  { %v2008_v22 = vpop.f32.mrb[9].mxu1  ;;  %v650_v33 = vmul.f32 %v2005_v21, %v2005_v21 }
 0x285   :  { %v625_v58 = vadd.f32 %v624_v52, %v2008_v22  ;;  %v648_v6 = vmul.f32 %v2008_v22, %v2008_v22  ;;  %v662_v23 = vadd.f32 %v661_v59, %v647_v20  ;;  %v2013_v28 = vpop.f32.mrb[10].mxu1  ;;  %v456_v52 = vld [vmem:[%s2224_s5 + $0x3] sm:$0x1] }
 0x286   :  { %v2015_v29 = vpop.f32.mrb[11].mxu1  ;;  %v651_v37 = vmul.f32 %v2013_v28, %v2013_v28 }
 0x287   :  { %v663_v30 = vadd.f32 %v662_v23, %v648_v6  ;;  %v626_v31 = vadd.f32 %v625_v58, %v2015_v29  ;;  %v649_v32 = vmul.f32 %v2015_v29, %v2015_v29 }
 0x289   :  { %v627_v34 = vadd.f32 %v2005_v21, %v626_v31  ;;  %v664_v35 = vadd.f32 %v663_v30, %v649_v32 }
 0x28b   :  { %v665_v39 = vadd.f32 %v664_v35, %v650_v33  ;;  %v2025_v40 = vpop.f32.mrb[12].mxu1  ;;  %v628_v41 = vadd.f32 %v2013_v28, %v627_v34 }
 0x28c   :  { %v603_v44 = vpop.f32.mrb[13].mxu1  ;;  %v654_v56 = vmul.f32 %v2025_v40, %v2025_v40 }
 0x28d   :  { %v629_v45 = vadd.f32 %v628_v41, %v603_v44  ;;  %v652_v46 = vmul.f32 %v603_v44, %v603_v44  ;;  %v666_v47 = vadd.f32 %v665_v39, %v651_v37  ;;  %v2028_v48 = vpop.f32.mrb[14].mxu1 }
 0x28e   :  { %v606_v49 = vpop.f32.mrb[15].mxu1  ;;  %v655_v10 = vmul.f32 %v2028_v48, %v2028_v48 }
 0x28f   :  { %v667_v50 = vadd.f32 %v666_v47, %v652_v46  ;;  %v630_v53 = vadd.f32 %v629_v45, %v606_v49  ;;  %v653_v55 = vmul.f32 %v606_v49, %v606_v49 }
 0x291   :  { %v631_v4 = vadd.f32 %v2025_v40, %v630_v53  ;;  %v668_v57 = vadd.f32 %v667_v50, %v653_v55 }
 0x293   :  { %v632_v60 = vadd.f32 %v2028_v48, %v631_v4  ;;  %v669_v61 = vadd.f32 %v668_v57, %v654_v56 }
 0x295   :  { %v633_v62 = vrot.slane %v632_v60, 4  ;;  %v670_v63 = vadd.f32 %v669_v61, %v655_v10 }
 0x297   :  { %v634_v5 = vadd.f32 %v633_v62, %v632_v60  ;;  %v671_v7 = vrot.slane %v670_v63, 4 }
 0x299   :  { %v635_v8 = vrot.slane %v634_v5, 2  ;;  %v672_v9 = vadd.f32 %v671_v7, %v670_v63 }
 0x29b   :  { %v636_v11 = vadd.f32 %v635_v8, %v634_v5  ;;  %v673_v25 = vrot.slane %v672_v9, 2 }
 0x29d   :  { %v637_v27 = vrot.slane %v636_v11, 1  ;;  %v674_v24 = vadd.f32 %v673_v25, %v672_v9 }
 0x29f   :  { %v638_v26 = vadd.f32 %v637_v27, %v636_v11  ;;  %v675_v38 = vrot.slane %v674_v24, 1 }
 0x2a1   :  { %v639_v14 = vmul.f32 0.0078125, %v638_v26  ;;  %v676_v43 = vadd.f32 %v675_v38, %v674_v24 }
 0x2a3   :  { %v677_v17 = vmul.f32 0.0078125, %v676_v43  ;;  %v678_v36 = vmul.f32 %v639_v14, %v639_v14 }
 0x2a5   :  { %v679_v18 = vsub.f32 %v677_v17, %v678_v36 }
 0x2a7   :  { %v680_v42 = vmax.f32 %v679_v18, 0.0 }
 0x2a9   :  { %v681_v19 = vadd.f32 1e-05, %v680_v42 }
 0x2ab   :  { %1564 = vrsqrt.f32 %v681_v19 }
 0x2b5   :  { %v1565_v20 = vpop.eup %1564 }
 0x2b6   :  { %v683_v59 = vmul.f32 %v1565_v20, %v455_v54 }
 0x2b8   :  { %v684_v58 = vmul.f32 %v683_v59, %v639_v14  ;;  %v2043_v6 = vrot.slane %v683_v59, %v1945_v51  ;;  %v1555_v59 = vld [vmem:[#allocation10 + $0x8] sm:$0xff]  }
 0x2ba   :  { %v685_v23 = vsub.f32 %v456_v52, %v684_v58  ;;  %v703_v30 = vmul.f32 %v2043_v6, %v606_v49  ;;  %v690_v31 = vmul.f32 %v2043_v6, %v1968_v1  ;;  %v691_v32 = vmul.f32 %v2043_v6, %v1972_v3  ;;  %v1556_v52 = vld [vmem:[#allocation10 + $0x10] sm:$0xff]   ;;  %v1557_v58 = vld [vmem:[#allocation10 + $0x18] sm:$0xff]  }
 0x2bb   :  { %v692_v33 = vmul.f32 %v1966_v0, %v2043_v6  ;;  %v693_v34 = vmul.f32 %v1970_v2, %v2043_v6  ;;  %v694_v35 = vmul.f32 %v2043_v6, %v1988_v13  ;;  %v695_v37 = vmul.f32 %v2043_v6, %v1995_v16 }
 0x2bc   :  { %v2059_v39 = vrot.slane %v685_v23, %v1945_v51  ;;  %v696_v1 = vmul.f32 %v1985_v12, %v2043_v6  ;;  %v697_v3 = vmul.f32 %v1993_v15, %v2043_v6  ;;  %v698_v0 = vmul.f32 %v2043_v6, %v2008_v22  ;;  %v1559_v23 = vld [vmem:[#allocation10 + $0x28] sm:$0xff]  }
 0x2bd   :  { %v699_v2 = vmul.f32 %v2043_v6, %v2015_v29  ;;  %v700_v13 = vmul.f32 %v2005_v21, %v2043_v6  ;;  %v701_v16 = vmul.f32 %v2013_v28, %v2043_v6  ;;  %v702_v41 = vmul.f32 %v2043_v6, %v603_v44 }
 0x2be   :  { %v723_v45 = vadd.f32 %v2059_v39, %v703_v30  ;;  %v710_v12 = vadd.f32 %v2059_v39, %v690_v31  ;;  %v711_v15 = vadd.f32 %v2059_v39, %v691_v32  ;;  %v712_v46 = vadd.f32 %v2059_v39, %v692_v33  ;;  %v1560_v30 = vld [vmem:[#allocation10 + $0x30] sm:$0xff]   ;;  %v1561_v31 = vld [vmem:[#allocation10 + $0x38] sm:$0xff]  }
 0x2bf   :  { %v713_v22 = vadd.f32 %v2059_v39, %v693_v34  ;;  %v714_v29 = vadd.f32 %v2059_v39, %v694_v35  ;;  %v715_v47 = vadd.f32 %v2059_v39, %v695_v37  ;;  %v716_v21 = vadd.f32 %v2059_v39, %v696_v1 }
 0x2c0   :  { %v726_v49 = vmax.f32 %v710_v12, 0.0  ;;  %v727_v28 = vmax.f32 %v711_v15, 0.0  ;;  %v728_v50 = vmax.f32 %v712_v46, 0.0  ;;  %v717_v44 = vadd.f32 %v2059_v39, %v697_v3 }
 0x2c1   :  { %v729_v53 = vmax.f32 %v713_v22, 0.0  ;;  %v730_v55 = vmax.f32 %v714_v29, 0.0  ;;  %v731_v56 = vmax.f32 %v715_v47, 0.0  ;;  %v732_v4 = vmax.f32 %v716_v21, 0.0 }
 0x2c2   :  { %742 = vst [vmem:[#allocation11] sm:$0xff] %v726_v49  ;;  %743 = vst [vmem:[#allocation11 + $0x8] sm:$0xff] %v727_v28  ;;  %v758_v57 = vpack.c.bf16 %v727_v28, %v726_v49  ;;  %v733_v10 = vmax.f32 %v717_v44, 0.0  ;;  %v718_v60 = vadd.f32 %v2059_v39, %v698_v0  ;;  %v719_v61 = vadd.f32 %v2059_v39, %v699_v2 }
 0x2c3   :  { %744 = vst [vmem:[#allocation11 + $0x10] sm:$0xff] %v728_v50  ;;  %745 = vst [vmem:[#allocation11 + $0x18] sm:$0xff] %v729_v53  ;;  %v759_v62 = vpack.c.bf16 %v729_v53, %v728_v50  ;;  %v760_v63 = vpack.c.bf16 %v731_v56, %v730_v55  ;;  %v720_v5 = vadd.f32 %v2059_v39, %v700_v13  ;;  %v739_v26 = vmax.f32 %v723_v45, 0.0 }
 0x2c4   :  { %746 = vst [vmem:[#allocation11 + $0x20] sm:$0xff] %v730_v55  ;;  %747 = vst [vmem:[#allocation11 + $0x28] sm:$0xff] %v731_v56  ;;  %v721_v7 = vadd.f32 %v2059_v39, %v701_v16  ;;  %1463 = vmatprep.mubr.bf16.mxu0 %v758_v57  ;;  %v761_v8 = vpack.c.bf16 %v733_v10, %v732_v4  ;;  %v734_v9 = vmax.f32 %v718_v60, 0.0  ;;  %v735_v11 = vmax.f32 %v719_v61, 0.0 }
 0x2c5   :  { %748 = vst [vmem:[#allocation11 + $0x30] sm:$0xff] %v732_v4  ;;  %749 = vst [vmem:[#allocation11 + $0x38] sm:$0xff] %v733_v10  ;;  %v722_v25 = vadd.f32 %v2059_v39, %v702_v41  ;;  %1464 = vmatmul.mubr.bf16.vlgmr.msra.gmra.mrb[16].mxu0 %v759_v62  ;;  %v736_v27 = vmax.f32 %v720_v5, 0.0  ;;  %v704_v38 = vmul.f32 %v2025_v40, %v2043_v6 }
 0x2c6   :  { %v737_v24 = vmax.f32 %v721_v7, 0.0  ;;  %1467 = vmatprep.mubr.bf16.mxu0 %v760_v63  ;;  %750 = vst [vmem:[#allocation11 + $0x40] sm:$0xff] %v734_v9  ;;  %751 = vst [vmem:[#allocation11 + $0x48] sm:$0xff] %v735_v11  ;;  %v762_v14 = vpack.c.bf16 %v735_v11, %v734_v9  ;;  %v705_v17 = vmul.f32 %v2028_v48, %v2043_v6  ;;  %v1554_v48 = vld [vmem:[#allocation10] sm:$0xff]  }
 0x2c7   :  { %v738_v43 = vmax.f32 %v722_v25, 0.0  ;;  %752 = vst [vmem:[#allocation11 + $0x50] sm:$0xff] %v736_v27  ;;  %755 = vst [vmem:[#allocation11 + $0x68] sm:$0xff] %v739_v26  ;;  %v724_v18 = vadd.f32 %v2059_v39, %v704_v38  ;;  %1479 = vmatprep.subr.bf16.mxu1 %v1554_v48  ;;  %v1558_v6 = vld [vmem:[#allocation10 + $0x20] sm:$0xff]  }
 0x2c8   :  { %753 = vst [vmem:[#allocation11 + $0x58] sm:$0xff] %v737_v24  ;;  %v763_v36 = vpack.c.bf16 %v737_v24, %v736_v27  ;;  %v725_v19 = vadd.f32 %v2059_v39, %v705_v17  ;;  %1480 = vmatpush3.bf16.msra.mxu1 %v1554_v48 }
 0x2c9   :  { %754 = vst [vmem:[#allocation11 + $0x60] sm:$0xff] %v738_v43  ;;  %v764_v42 = vpack.c.bf16 %v739_v26, %v738_v43  ;;  %v740_v54 = vmax.f32 %v724_v18, 0.0  ;;  %1481 = vmatprep.subr.bf16.mxu1 %v1555_v59 }
 0x2ca   :  { %v741_v40 = vmax.f32 %v725_v19, 0.0 }
 0x2cb   :  { %756 = vst [vmem:[#allocation11 + $0x70] sm:$0xff] %v740_v54 }
 0x2cc   :  { %757 = vst [vmem:[#allocation11 + $0x78] sm:$0xff] %v741_v40  ;;  %v765_v20 = vpack.c.bf16 %v741_v40, %v740_v54  ;;  %1482 = vmatpush3.bf16.msra.mxu1 %v1555_v59 }
 0x2cd   :  { %1468 = vmatmul.mubr.bf16.gmra.mrb[20].mxu0 %v761_v8  ;;  %1483 = vmatprep.subr.bf16.mxu1 %v1556_v52 }
 0x2ce   :  { %1471 = vmatprep.mubr.bf16.mxu0 %v762_v14 }
 0x2d0   :  { %1484 = vmatpush3.bf16.msra.mxu1 %v1556_v52 }
 0x2d1   :  { %1485 = vmatprep.subr.bf16.mxu1 %v1557_v58 }
 0x2d4   :  { %1486 = vmatpush3.bf16.msra.mxu1 %v1557_v58 }
 0x2d5   :  { %1472 = vmatmul.mubr.bf16.gmra.mrb[24].mxu0 %v763_v36  ;;  %1487 = vmatprep.subr.bf16.mxu1 %v1558_v6 }
 0x2d6   :  { %1475 = vmatprep.mubr.bf16.mxu0 %v764_v42 }
 0x2d8   :  { %1488 = vmatpush3.bf16.msra.mxu1 %v1558_v6 }
 0x2d9   :  { %1489 = vmatprep.subr.bf16.mxu1 %v1559_v23 }
 0x2dc   :  { %1490 = vmatpush3.bf16.msra.mxu1 %v1559_v23 }
 0x2dd   :  { %1476 = vmatmul.mubr.bf16.gmra.mrb[28].mxu0 %v765_v20  ;;  %1491 = vmatprep.subr.bf16.mxu1 %v1560_v30 }
 0x2e0   :  { %1492 = vmatpush3.bf16.msra.mxu1 %v1560_v30 }
 0x2e1   :  { %1493 = vmatprep.subr.bf16.mxu1 %v1561_v31 }
 0x2e4   :  { %1494 = vmatpush3.bf16.msra.mxu1 %v1561_v31 }
 0x398   :  { %v2094_v32 = vpop.f32.mrb[16].mxu0 }
 0x399   :  { %v2096_v33 = vpop.f32.mrb[17].mxu0  ;;  %v953_v3 = vmul.f32 %v2094_v32, %v2094_v32 }
 0x39a   :  { %v2098_v34 = vpop.f32.mrb[18].mxu0  ;;  %v951_v37 = vmul.f32 %v2096_v33, %v2096_v33 }
 0x39b   :  { %v2100_v35 = vpop.f32.mrb[19].mxu0  ;;  %v954_v13 = vmul.f32 %v2098_v34, %v2098_v34 }
 0x39c   :  { %v929_v39 = vadd.f32 %v2100_v35, %v2096_v33  ;;  %v952_v1 = vmul.f32 %v2100_v35, %v2100_v35 }
 0x39e   :  { %v930_v0 = vadd.f32 %v2094_v32, %v929_v39  ;;  %v967_v2 = vadd.f32 %v952_v1, %v951_v37 }
 0x3a0   :  { %v968_v16 = vadd.f32 %v967_v2, %v953_v3  ;;  %v2113_v41 = vpop.f32.mrb[20].mxu0  ;;  %v931_v45 = vadd.f32 %v2098_v34, %v930_v0 }
 0x3a1   :  { %v2116_v12 = vpop.f32.mrb[21].mxu0  ;;  %v957_v50 = vmul.f32 %v2113_v41, %v2113_v41 }
 0x3a2   :  { %v932_v15 = vadd.f32 %v931_v45, %v2116_v12  ;;  %v955_v46 = vmul.f32 %v2116_v12, %v2116_v12  ;;  %v969_v22 = vadd.f32 %v968_v16, %v954_v13  ;;  %v2121_v29 = vpop.f32.mrb[22].mxu0 }
 0x3a3   :  { %v2123_v47 = vpop.f32.mrb[23].mxu0  ;;  %v958_v55 = vmul.f32 %v2121_v29, %v2121_v29 }
 0x3a4   :  { %v970_v21 = vadd.f32 %v969_v22, %v955_v46  ;;  %v933_v49 = vadd.f32 %v932_v15, %v2123_v47  ;;  %v956_v28 = vmul.f32 %v2123_v47, %v2123_v47 }
 0x3a6   :  { %v934_v44 = vadd.f32 %v2113_v41, %v933_v49  ;;  %v971_v53 = vadd.f32 %v970_v21, %v956_v28 }
 0x3a8   :  { %v972_v56 = vadd.f32 %v971_v53, %v957_v50  ;;  %v2133_v4 = vpop.f32.mrb[24].mxu0  ;;  %v935_v57 = vadd.f32 %v2121_v29, %v934_v44  ;;  %v766_v53 = vld [vmem:[%s2224_s5 + $0x4] sm:$0x1] }
 0x3a9   :  { %v2136_v10 = vpop.f32.mrb[25].mxu0  ;;  %v961_v11 = vmul.f32 %v2133_v4, %v2133_v4 }
 0x3aa   :  { %v936_v60 = vadd.f32 %v935_v57, %v2136_v10  ;;  %v959_v61 = vmul.f32 %v2136_v10, %v2136_v10  ;;  %v973_v62 = vadd.f32 %v972_v56, %v958_v55  ;;  %v2141_v63 = vpop.f32.mrb[26].mxu0  ;;  %v767_v57 = vld [vmem:[%s2224_s5 + $0x5] sm:$0x1] }
 0x3ab   :  { %v2143_v5 = vpop.f32.mrb[27].mxu0  ;;  %v962_v24 = vmul.f32 %v2141_v63, %v2141_v63 }
 0x3ac   :  { %v974_v7 = vadd.f32 %v973_v62, %v959_v61  ;;  %v937_v8 = vadd.f32 %v936_v60, %v2143_v5  ;;  %v960_v9 = vmul.f32 %v2143_v5, %v2143_v5 }
 0x3ae   :  { %v938_v25 = vadd.f32 %v2133_v4, %v937_v8  ;;  %v975_v27 = vadd.f32 %v974_v7, %v960_v9 }
 0x3b0   :  { %v976_v26 = vadd.f32 %v975_v27, %v961_v11  ;;  %v2153_v38 = vpop.f32.mrb[28].mxu0  ;;  %v939_v14 = vadd.f32 %v2141_v63, %v938_v25 }
 0x3b1   :  { %v914_v43 = vpop.f32.mrb[29].mxu0  ;;  %v965_v48 = vmul.f32 %v2153_v38, %v2153_v38 }
 0x3b2   :  { %v940_v17 = vadd.f32 %v939_v14, %v914_v43  ;;  %v963_v36 = vmul.f32 %v914_v43, %v914_v43  ;;  %v977_v18 = vadd.f32 %v976_v26, %v962_v24  ;;  %v2156_v42 = vpop.f32.mrb[30].mxu0 }
 0x3b3   :  { %v917_v19 = vpop.f32.mrb[31].mxu0  ;;  %v966_v58 = vmul.f32 %v2156_v42, %v2156_v42 }
 0x3b4   :  { %v978_v54 = vadd.f32 %v977_v18, %v963_v36  ;;  %v941_v40 = vadd.f32 %v940_v17, %v917_v19  ;;  %v964_v20 = vmul.f32 %v917_v19, %v917_v19 }
 0x3b6   :  { %v942_v59 = vadd.f32 %v2153_v38, %v941_v40  ;;  %v979_v52 = vadd.f32 %v978_v54, %v964_v20 }
 0x3b8   :  { %v943_v6 = vadd.f32 %v2156_v42, %v942_v59  ;;  %v980_v23 = vadd.f32 %v979_v52, %v965_v48 }
 0x3ba   :  { %v944_v30 = vrot.slane %v943_v6, 4  ;;  %v981_v31 = vadd.f32 %v980_v23, %v966_v58 }
 0x3bc   :  { %v945_v37 = vadd.f32 %v944_v30, %v943_v6  ;;  %v982_v39 = vrot.slane %v981_v31, 4 }
 0x3be   :  { %v946_v1 = vrot.slane %v945_v37, 2  ;;  %v983_v3 = vadd.f32 %v982_v39, %v981_v31 }
 0x3c0   :  { %v947_v0 = vadd.f32 %v946_v1, %v945_v37  ;;  %v984_v2 = vrot.slane %v983_v3, 2 }
 0x3c2   :  { %v948_v13 = vrot.slane %v947_v0, 1  ;;  %v985_v16 = vadd.f32 %v984_v2, %v983_v3 }
 0x3c4   :  { %v949_v45 = vadd.f32 %v948_v13, %v947_v0  ;;  %v986_v15 = vrot.slane %v985_v16, 1 }
 0x3c6   :  { %v950_v46 = vmul.f32 0.0078125, %v949_v45  ;;  %v987_v22 = vadd.f32 %v986_v15, %v985_v16 }
 0x3c8   :  { %v988_v21 = vmul.f32 0.0078125, %v987_v22  ;;  %v989_v49 = vmul.f32 %v950_v46, %v950_v46 }
 0x3ca   :  { %v990_v28 = vsub.f32 %v988_v21, %v989_v49 }
 0x3cc   :  { %v991_v50 = vmax.f32 %v990_v28, 0.0 }
 0x3ce   :  { %v992_v44 = vadd.f32 1e-05, %v991_v50 }
 0x3d0   :  { %1566 = vrsqrt.f32 %v992_v44 }
 0x3da   :  { %v1567_v55 = vpop.eup %1566 }
 0x3db   :  { %v994_v56 = vmul.f32 %v1567_v55, %v766_v53 }
 0x3dd   :  { %v995_v60 = vmul.f32 %v994_v56, %v950_v46  ;;  %v1000_v61 = vrot.slane %v994_v56, %v1945_v51 }
 0x3df   :  { %v996_v62 = vsub.f32 %v767_v57, %v995_v60  ;;  %v1014_v7 = vmul.f32 %v1000_v61, %v917_v19  ;;  %v1001_v8 = vmul.f32 %v1000_v61, %v2096_v33  ;;  %v1002_v9 = vmul.f32 %v1000_v61, %v2100_v35 }
 0x3e0   :  { %v1003_v11 = vmul.f32 %v2094_v32, %v1000_v61  ;;  %v1004_v25 = vmul.f32 %v2098_v34, %v1000_v61  ;;  %v1005_v27 = vmul.f32 %v1000_v61, %v2116_v12  ;;  %v1006_v24 = vmul.f32 %v1000_v61, %v2123_v47 }
 0x3e1   :  { %v1020_v26 = vrot.slane %v996_v62, %v1945_v51  ;;  %v1007_v14 = vmul.f32 %v2113_v41, %v1000_v61  ;;  %v1008_v17 = vmul.f32 %v2121_v29, %v1000_v61  ;;  %v1009_v36 = vmul.f32 %v1000_v61, %v2136_v10 }
 0x3e2   :  { %v1010_v33 = vmul.f32 %v1000_v61, %v2143_v5  ;;  %v1011_v35 = vmul.f32 %v2133_v4, %v1000_v61  ;;  %v1012_v32 = vmul.f32 %v2141_v63, %v1000_v61  ;;  %v1013_v18 = vmul.f32 %v1000_v61, %v914_v43 }
 0x3e3   :  { %v1034_v34 = vadd.f32 %v1020_v26, %v1014_v7  ;;  %v1021_v19 = vadd.f32 %v1020_v26, %v1001_v8  ;;  %v1022_v12 = vadd.f32 %v1020_v26, %v1002_v9  ;;  %v1023_v54 = vadd.f32 %v1020_v26, %v1003_v11 }
 0x3e4   :  { %v1024_v47 = vadd.f32 %v1020_v26, %v1004_v25  ;;  %v1025_v40 = vadd.f32 %v1020_v26, %v1005_v27  ;;  %v1026_v51 = vadd.f32 %v1020_v26, %v1006_v24  ;;  %v1027_v20 = vadd.f32 %v1020_v26, %v1007_v14 }
 0x3e5   :  { %v1050_v41 = vmax.f32 %v1034_v34, 0.0  ;;  %v1037_v48 = vmax.f32 %v1021_v19, 0.0  ;;  %v1038_v29 = vmax.f32 %v1022_v12, 0.0  ;;  %v1039_v59 = vmax.f32 %v1023_v54, 0.0 }
 0x3e6   :  { %v1040_v10 = vmax.f32 %v1024_v47, 0.0  ;;  %v1041_v52 = vmax.f32 %v1025_v40, 0.0  ;;  %v1042_v5 = vmax.f32 %v1026_v51, 0.0  ;;  %v1028_v58 = vadd.f32 %v1020_v26, %v1008_v17 }
 0x3e7   :  { %v1053_v4 = vpack.c.bf16 %v1038_v29, %v1037_v48  ;;  %v1043_v6 = vmax.f32 %v1027_v20, 0.0  ;;  %v1029_v63 = vadd.f32 %v1020_v26, %v1009_v36  ;;  %v1030_v43 = vadd.f32 %v1020_v26, %v1010_v33 }
 0x3e8   :  { %v1054_v23 = vpack.c.bf16 %v1040_v10, %v1039_v59  ;;  %v1055_v30 = vpack.c.bf16 %v1042_v5, %v1041_v52  ;;  %v1044_v31 = vmax.f32 %v1028_v58, 0.0  ;;  %v1031_v37 = vadd.f32 %v1020_v26, %v1011_v35 }
 0x3e9   :  { %1495 = vmatprep.mubr.bf16.mxu1 %v1053_v4  ;;  %v1045_v39 = vmax.f32 %v1029_v63, 0.0  ;;  %v1046_v1 = vmax.f32 %v1030_v43, 0.0  ;;  %v1032_v3 = vadd.f32 %v1020_v26, %v1012_v32  ;;  %v1033_v0 = vadd.f32 %v1020_v26, %v1013_v18 }
 0x3ea   :  { %1496 = vmatmul.mubr.bf16.vlgmr.msra.gmra.mrb[16].mxu1 %v1054_v23  ;;  %v1056_v2 = vpack.c.bf16 %v1044_v31, %v1043_v6  ;;  %v1047_v13 = vmax.f32 %v1031_v37, 0.0  ;;  %v1015_v16 = vmul.f32 %v2153_v38, %v1000_v61  ;;  %v1016_v45 = vmul.f32 %v2156_v42, %v1000_v61 }
 0x3eb   :  { %1499 = vmatprep.mubr.bf16.mxu1 %v1055_v30  ;;  %v1057_v15 = vpack.c.bf16 %v1046_v1, %v1045_v39  ;;  %v1048_v46 = vmax.f32 %v1032_v3, 0.0  ;;  %v1049_v22 = vmax.f32 %v1033_v0, 0.0 }
 0x3ec   :  { %v1035_v21 = vadd.f32 %v1020_v26, %v1015_v16  ;;  %v1036_v49 = vadd.f32 %v1020_v26, %v1016_v45 }
 0x3ed   :  { %v1058_v28 = vpack.c.bf16 %v1048_v46, %v1047_v13  ;;  %v1059_v50 = vpack.c.bf16 %v1050_v41, %v1049_v22 }
 0x3ee   :  { %v1051_v44 = vmax.f32 %v1035_v21, 0.0  ;;  %v1052_v53 = vmax.f32 %v1036_v49, 0.0 }
 0x3f0   :  { %v1060_v55 = vpack.c.bf16 %v1052_v53, %v1051_v44 }
 0x3f2   :  { %1500 = vmatmul.mubr.bf16.gmra.mrb[20].mxu1 %v1056_v2 }
 0x3f3   :  { %1503 = vmatprep.mubr.bf16.mxu1 %v1057_v15 }
 0x3fa   :  { %1504 = vmatmul.mubr.bf16.gmra.mrb[24].mxu1 %v1058_v28 }
 0x3fb   :  { %1507 = vmatprep.mubr.bf16.mxu1 %v1059_v50 }
 0x402   :  { %1508 = vmatmul.mubr.bf16.gmra.mrb[28].mxu1 %v1060_v55 }
 0x403   :  { %1689 = shalt.err (!%p1686_p2)
}
 0x404   :  { %s1690_s28 = scalar_lea.hbm %s2225_s6, 2048 }
 0x405   :  { %p1691_p3 = scmp.ne.s32.totalorder %s2225_s6, %s1690_s28  ;;  %p1694_p4 = scmp.lt.u32.totalorder %s1690_s28, %s2225_s6 }
 0x407   :  { %p1696_p5 = pnand %p1694_p4, %p1691_p3 }
 0x409   :  { %1699 = shalt.err (!%p1696_p5)
}
 0x40a   :  { %s1740_s11 = smov 128   ;;  %s1741_s12 = smov 8   ;;  %v1310_v38 = vld [vmem:[%s2224_s5 + $0x6] ss:$0 sm:$0xff] }
 0x40b   :  { %1254 = dma.vmem_to_hbm [thread:$0]  %s1249_s1, 2048, %s2225_s6, [#allocation4], %s1740_s11, %s1740_s11, %s1741_s12  }
 0x40c   :  { %s1742_s5 = smov [#allocation12]  }
 0x40d   :  { %s1260_s6 = sshll.u32 %s1742_s5, 4  ;;  %s1261_s6 = int_to_ptr.vmem [resolvable:$true] %s1260_s6 }
 0x40e   :  { %s1700_s4 = scalar_lea.vmem %s1261_s6, 2048  ;;  %p1705_p7 = scmp.lt.s32.totalorder %s1261_s6, %s1261_s6 }
 0x40f   :  { %p1701_p6 = scmp.ne.s32.totalorder %s1261_s6, %s1700_s4  ;;  %p1706_p8 = scmp.lt.s32.totalorder %s1700_s4, %s1700_s4 }
 0x411   :  { %p1707_p9 = por %p1706_p8, %p1705_p7 }
 0x413   :  { %p1708_p10 = pnand %p1707_p9, %p1701_p6 }
 0x4bd   :  { %v1497_v42 = vpop.f32.mrb[16].mxu1 }
 0x4be   :  { %v1173_v56 = vadd.f32 %v1497_v42, %v1310_v38  ;;  %v1164_v57 = vpop.f32.mrb[17].mxu1 }
 0x4bf   :  { %v1165_v60 = vadd.f32 %v1310_v38, %v1164_v57  ;;  %v1498_v61 = vpop.f32.mrb[18].mxu1 }
 0x4c0   :  { %1229 = vst [vmem:[#allocation12 + $0x10] sm:$0xff] %v1173_v56  ;;  %v1176_v62 = vadd.f32 %v1498_v61, %v1310_v38  ;;  %v1167_v7 = vpop.f32.mrb[19].mxu1 }
 0x4c1   :  { %1227 = vst [vmem:[#allocation12] sm:$0xff] %v1165_v60  ;;  %v1168_v8 = vadd.f32 %v1310_v38, %v1167_v7 }
 0x4c2   :  { %1230 = vst [vmem:[#allocation12 + $0x18] sm:$0xff] %v1176_v62 }
 0x4c3   :  { %1228 = vst [vmem:[#allocation12 + $0x8] sm:$0xff] %v1168_v8 }
 0x4c5   :  { %v1501_v9 = vpop.f32.mrb[20].mxu1 }
 0x4c6   :  { %v1189_v11 = vadd.f32 %v1501_v9, %v1310_v38  ;;  %v1180_v25 = vpop.f32.mrb[21].mxu1 }
 0x4c7   :  { %v1181_v27 = vadd.f32 %v1310_v38, %v1180_v25  ;;  %v1502_v24 = vpop.f32.mrb[22].mxu1 }
 0x4c8   :  { %1233 = vst [vmem:[#allocation12 + $0x30] sm:$0xff] %v1189_v11  ;;  %v1192_v26 = vadd.f32 %v1502_v24, %v1310_v38  ;;  %v1183_v14 = vpop.f32.mrb[23].mxu1 }
 0x4c9   :  { %1231 = vst [vmem:[#allocation12 + $0x20] sm:$0xff] %v1181_v27  ;;  %v1184_v17 = vadd.f32 %v1310_v38, %v1183_v14 }
 0x4ca   :  { %1234 = vst [vmem:[#allocation12 + $0x38] sm:$0xff] %v1192_v26 }
 0x4cb   :  { %1232 = vst [vmem:[#allocation12 + $0x28] sm:$0xff] %v1184_v17 }
 0x4cd   :  { %v1505_v36 = vpop.f32.mrb[24].mxu1 }
 0x4ce   :  { %v1205_v33 = vadd.f32 %v1505_v36, %v1310_v38  ;;  %v1196_v35 = vpop.f32.mrb[25].mxu1 }
 0x4cf   :  { %v1197_v32 = vadd.f32 %v1310_v38, %v1196_v35  ;;  %v1506_v18 = vpop.f32.mrb[26].mxu1 }
 0x4d0   :  { %1237 = vst [vmem:[#allocation12 + $0x50] sm:$0xff] %v1205_v33  ;;  %v1208_v34 = vadd.f32 %v1506_v18, %v1310_v38  ;;  %v1199_v19 = vpop.f32.mrb[27].mxu1 }
 0x4d1   :  { %1235 = vst [vmem:[#allocation12 + $0x40] sm:$0xff] %v1197_v32  ;;  %v1200_v12 = vadd.f32 %v1310_v38, %v1199_v19 }
 0x4d2   :  { %1238 = vst [vmem:[#allocation12 + $0x58] sm:$0xff] %v1208_v34 }
 0x4d3   :  { %1236 = vst [vmem:[#allocation12 + $0x48] sm:$0xff] %v1200_v12 }
 0x4d5   :  { %v1509_v54 = vpop.f32.mrb[28].mxu1 }
 0x4d6   :  { %v1221_v47 = vadd.f32 %v1509_v54, %v1310_v38  ;;  %v1212_v40 = vpop.f32.mrb[29].mxu1 }
 0x4d7   :  { %v1213_v51 = vadd.f32 %v1310_v38, %v1212_v40  ;;  %v1510_v20 = vpop.f32.mrb[30].mxu1 }
 0x4d8   :  { %1241 = vst [vmem:[#allocation12 + $0x70] sm:$0xff] %v1221_v47  ;;  %v1224_v41 = vadd.f32 %v1510_v20, %v1310_v38  ;;  %v1215_v48 = vpop.f32.mrb[31].mxu1 }
 0x4d9   :  { %1239 = vst [vmem:[#allocation12 + $0x60] sm:$0xff] %v1213_v51  ;;  %v1216_v29 = vadd.f32 %v1310_v38, %v1215_v48 }
 0x4da   :  { %1242 = vst [vmem:[#allocation12 + $0x78] sm:$0xff] %v1224_v41 }
 0x4db   :  { %1240 = vst [vmem:[#allocation12 + $0x68] sm:$0xff] %v1216_v29 }
 0x4dc   :  { %1711 = shalt.err (!%p1708_p10)
}
 0x4dd   :  { %s1712_s3 = scalar_lea.hbm %s2226_s7, 2048 }
 0x4de   :  { %p1713_p11 = scmp.ne.s32.totalorder %s2226_s7, %s1712_s3  ;;  %p1716_p12 = scmp.lt.u32.totalorder %s1712_s3, %s2226_s7 }
 0x4e0   :  { %p1718_p13 = pnand %p1716_p12, %p1713_p11 }
 0x4e2   :  { %1721 = shalt.err (!%p1718_p13)
}
 0x4e3   :  { %1266 = dma.vmem_to_hbm [thread:$0]  %s1261_s6, 2048, %s2226_s7, [#allocation13], %s1740_s11, %s1740_s11, %s1741_s12  }
 0x4e4   :  { %1728 = dma.done.wait [#allocation4], 2048  }
 0x4e5   :  { %1729 = vsyncadd [#allocation4], 4294965248 }
 0x4e6   :  { %1730 = dma.done.wait [#allocation13], 2048  }
 0x4e7   :  { %1731 = vsyncadd [#allocation13], 4294965248 }
 0x4e8   :  { %1273 = vsyncpa [#allocation3], 1 }
 0x4e9   :  { %1274 = vsyncpa [#allocation6], 1 }
 0x4ea   :  { %1275 = vsyncpa [#allocation9], 1 }
 0x4eb   :  { %1276 = vsyncpa [#allocation4], 1 }
 0x4ec   :  { %1277 = vsyncpa [#allocation13], 1 }

</bundles_post_ra>
